<compile_context>
chip_gen: v7x
topology: tpu7x:2x2x1
jax: 0.10.0
libtpu: 0.0.40
codegen_flags: <defaults>
</compile_context>

<pallas_src>
import functools

import jax
import jax.numpy as jnp
from jax.experimental import pallas as pl
from jax.experimental.pallas import tpu as pltpu

_NEG_BIG = -1e30  # pad value for tag-head bias lanes (exp underflows to 0)


def _lstm_tagger_kernel(ids_ref, emb_ref, wih_ref, b_ref, whh_ref, wt_ref,
                        bt_ref, out_ref, *, seq_len, hidden_dim, batch,
                        vocab_pad):
    """Whole forward pass in one kernel invocation (grid = ())."""
    H = hidden_dim
    Bp = batch
    S = seq_len
    SB = S * Bp

    # ---- Input projection, hoisted out of the recurrence -------------------
    # Project the (tiny, padded) embedding table once: (Vp, E) @ (E, 4H) + b.
    emb_proj = (jnp.dot(emb_ref[...], wih_ref[...],
                        preferred_element_type=jnp.float32) + b_ref[...])
    # Embedding lookup folded into the kernel via an exact one-hot matmul:
    # (SB, Vp) @ (Vp, 4H) -> all x_t @ W_ih^T + b, time-major.
    ids = ids_ref[...]                                           # (SB, 1) i32
    vocab_iota = jax.lax.broadcasted_iota(jnp.int32, (SB, vocab_pad), 1)
    onehot = (vocab_iota == ids).astype(jnp.float32)             # exact 0/1
    gates_x = jnp.dot(onehot, emb_proj,
                      preferred_element_type=jnp.float32)        # (SB, 4H)

    # ---- Loop-invariant values (hoisted: not re-emitted per unrolled step) --
    w_hh = whh_ref[...]                                          # (H, 4H)
    lane = jax.lax.broadcasted_iota(jnp.int32, (Bp, 4 * H), 1)
    g_mask = jnp.logical_and(lane >= 2 * H, lane < 3 * H)        # g-gate lanes
    # sigmoid(x) = 0.5*(1 + tanh(0.5*x)); g gate keeps plain tanh(x).
    pre_scale = jnp.where(g_mask, 1.0, 0.5).astype(jnp.float32)
    post_scale = pre_scale
    post_off = jnp.where(g_mask, 0.0, 0.5).astype(jnp.float32)

    # matches LSTMTaggerBatch.init_hidden(): zeros for h0 and c0
    h = jnp.zeros((Bp, H), jnp.float32)
    c = jnp.zeros((Bp, H), jnp.float32)

    h_list = []
    for t in range(S):                       # S static -> fully unrolled
        gx = gates_x[t * Bp:(t + 1) * Bp, :]                     # aligned tile
        gates = gx + jnp.dot(h, w_hh, preferred_element_type=jnp.float32)
        # One tanh pass over the full (Bp, 4H) tile; affine fixup on VPU.
        th = jnp.tanh(gates * pre_scale)
        act = th * post_scale + post_off
        i_g = act[:, 0 * H:1 * H]
        f_g = act[:, 1 * H:2 * H]
        g_g = act[:, 2 * H:3 * H]
        o_g = act[:, 3 * H:4 * H]
        c = f_g * c + i_g * g_g
        h = o_g * jnp.tanh(c)
        h_list.append(h)                     # keep h_t in registers

    # ---- Batched tag head + log-softmax over the whole sequence ------------
    hs = jnp.concatenate(h_list, axis=0)                         # (SB, H)
    tag_space = (jnp.dot(hs, wt_ref[...], preferred_element_type=jnp.float32)
                 + bt_ref[...])                                  # (SB, Tp)
    m = jnp.max(tag_space, axis=-1, keepdims=True)
    shifted = tag_space - m
    lse = jnp.log(jnp.sum(jnp.exp(shifted), axis=-1, keepdims=True))
    out_ref[...] = (shifted - lse).astype(out_ref.dtype)         # lane-dense


def prepare_lstm_tagger_params(params, *, hidden_dim):
    """One-time parameter prep (out of the per-call hot path)."""
    H = hidden_dim
    emb = params["embedding"].astype(jnp.float32)                # (V, E)
    V, E = emb.shape
    Vp = ((V + 7) // 8) * 8
    T = params["w_tag"].shape[0]
    Tp = ((T + 127) // 128) * 128
    return dict(
        emb=jnp.pad(emb, ((0, Vp - V), (0, 0))),                 # (Vp, E)
        w_ih_t=params["w_ih"].T.astype(jnp.float32),             # (E, 4H)
        w_hh_t=params["w_hh"].T.astype(jnp.float32),             # (H, 4H)
        bias=(params["b_ih"] + params["b_hh"]).reshape(1, 4 * H)
             .astype(jnp.float32),                               # (1, 4H)
        wt_t=jnp.pad(params["w_tag"].T.astype(jnp.float32),
                     ((0, 0), (0, Tp - T))),                     # (H, Tp)
        bt=jnp.pad(params["b_tag"].reshape(1, T).astype(jnp.float32),
                   ((0, 0), (0, Tp - T)), constant_values=_NEG_BIG),  # (1, Tp)
        H=H, E=E, V=V, Vp=Vp, T=T, Tp=Tp,
    )


def lstm_tagger_forward(sentence, prep):
    """sentence: (B, S) int32.  Returns (B, S, tagset) float32 log-probs."""
    B, S = sentence.shape
    H, T, Tp, Vp = prep["H"], prep["T"], prep["Tp"], prep["Vp"]
    Bp = max(8, ((B + 7) // 8) * 8)                              # sublane pad

    # Only tiny int32 glue remains outside the kernel: time-major, padded ids.
    ids = jnp.pad(sentence.astype(jnp.int32), ((0, Bp - B), (0, 0)))  # (Bp, S)
    ids = jnp.transpose(ids).reshape(S * Bp, 1)                  # (S*Bp, 1)

    kernel = functools.partial(_lstm_tagger_kernel, seq_len=S, hidden_dim=H,
                               batch=Bp, vocab_pad=Vp)

    out2d = pl.pallas_call(
        kernel,
        out_shape=jax.ShapeDtypeStruct((S * Bp, Tp), jnp.float32),
        in_specs=[pl.BlockSpec(memory_space=pltpu.MemorySpace.VMEM)
                  for _ in range(7)],
        out_specs=pl.BlockSpec(memory_space=pltpu.MemorySpace.VMEM),
    )(ids, prep["emb"], prep["w_ih_t"], prep["bias"], prep["w_hh_t"],
      prep["wt_t"], prep["bt"])

    out = out2d.reshape(S, Bp, Tp)
    out = jnp.transpose(out, (1, 0, 2))[:B, :, :T]               # (B, S, T)
    return out


def _reference_forward(sentence, params, *, hidden_dim):
    """Pure-JAX reference mirroring PyTorch nn.LSTM semantics."""
    emb = params["embedding"]
    H = hidden_dim
    embeds = jnp.take(emb, sentence, axis=0)                     # (B, S, E)
    B = embeds.shape[0]
    w_ih, w_hh = params["w_ih"], params["w_hh"]
    b = params["b_ih"] + params["b_hh"]

    def step(carry, x_t):
        h, c = carry
        gates = x_t @ w_ih.T + h @ w_hh.T + b
        i = jax.nn.sigmoid(gates[:, 0 * H:1 * H])
        f = jax.nn.sigmoid(gates[:, 1 * H:2 * H])
        g = jnp.tanh(gates[:, 2 * H:3 * H])
        o = jax.nn.sigmoid(gates[:, 3 * H:4 * H])
        c_new = f * c + i * g
        h_new = o * jnp.tanh(c_new)
        return (h_new, c_new), h_new

    h0 = jnp.zeros((B, H), jnp.float32)
    c0 = jnp.zeros((B, H), jnp.float32)
    _, hs = jax.lax.scan(step, (h0, c0), jnp.transpose(embeds, (1, 0, 2)))
    hs = jnp.transpose(hs, (1, 0, 2))                            # (B, S, H)
    tag_space = hs @ params["w_tag"].T + params["b_tag"]
    return jax.nn.log_softmax(tag_space, axis=2)


if __name__ == "__main__":
    # Small shapes consistent with the module: batch_size=5 (hard-coded in the
    # PyTorch file), seq=8, embedding_dim=32, hidden_dim=32, vocab=20, tags=8.
    batch_size = 5
    seq_len = 8
    embedding_dim = 32
    hidden_dim = 32
    vocab_size = 20
    tagset_size = 8

    key = jax.random.PRNGKey(0)
    k = jax.random.split(key, 8)
    params = {
        "embedding": jax.random.normal(k[0], (vocab_size, embedding_dim),
                                       jnp.float32),
        "w_ih": 0.1 * jax.random.normal(k[1], (4 * hidden_dim, embedding_dim),
                                        jnp.float32),
        "w_hh": 0.1 * jax.random.normal(k[2], (4 * hidden_dim, hidden_dim),
                                        jnp.float32),
        "b_ih": 0.1 * jax.random.normal(k[3], (4 * hidden_dim,), jnp.float32),
        "b_hh": 0.1 * jax.random.normal(k[4], (4 * hidden_dim,), jnp.float32),
        "w_tag": 0.1 * jax.random.normal(k[5], (tagset_size, hidden_dim),
                                         jnp.float32),
        "b_tag": 0.1 * jax.random.normal(k[6], (tagset_size,), jnp.float32),
    }
    sentence = jax.random.randint(k[7], (batch_size, seq_len), 0, vocab_size,
                                  dtype=jnp.int32)

    prep = prepare_lstm_tagger_params(params, hidden_dim=hidden_dim)
    out = lstm_tagger_forward(sentence, prep)
    out = jax.block_until_ready(out)

    ref = _reference_forward(sentence, params, hidden_dim=hidden_dim)
    assert out.shape == (batch_size, seq_len, tagset_size)
    assert jnp.allclose(out, ref, rtol=1e-3, atol=1e-3)

    print("KERNEL_OK")
</pallas_src>

<mosaic_0001>
module attributes {stable_mosaic.version = 11 : i64} {
  func.func @_lstm_tagger_kernel(%arg0: memref<64x1xi32, #tpu.memory_space<vmem>>, %arg1: memref<24x32xf32, #tpu.memory_space<vmem>>, %arg2: memref<32x128xf32, #tpu.memory_space<vmem>>, %arg3: memref<1x128xf32, #tpu.memory_space<vmem>>, %arg4: memref<32x128xf32, #tpu.memory_space<vmem>>, %arg5: memref<32x128xf32, #tpu.memory_space<vmem>>, %arg6: memref<1x128xf32, #tpu.memory_space<vmem>>, %arg7: memref<64x128xf32, #tpu.memory_space<vmem>>) attributes {dimension_semantics = [], scalar_prefetch = 0 : i64, scratch_operands = 0 : i64, tpu.core_type = #tpu.core_type<tc>} {
    %c0 = arith.constant 0 : index
    %c0_0 = arith.constant 0 : index
    %0 = vector.load %arg1[%c0, %c0_0] : memref<24x32xf32, #tpu.memory_space<vmem>>, vector<24x32xf32>
    %c0_1 = arith.constant 0 : index
    %c0_2 = arith.constant 0 : index
    %1 = vector.load %arg2[%c0_1, %c0_2] : memref<32x128xf32, #tpu.memory_space<vmem>>, vector<32x128xf32>
    %cst = arith.constant dense<0.000000e+00> : vector<24x128xf32>
    %2 = tpu.matmul %0, %1, %cst {dimension_numbers = #tpu.dot_dimension_numbers<[1], [0], [0], [1], [0, 0, 1, 1], [], []>} : vector<24x32xf32>, vector<32x128xf32>, vector<24x128xf32> -> vector<24x128xf32>
    %c0_3 = arith.constant 0 : index
    %c0_4 = arith.constant 0 : index
    %3 = vector.load %arg3[%c0_3, %c0_4] : memref<1x128xf32, #tpu.memory_space<vmem>>, vector<1x128xf32>
    %4 = vector.broadcast %3 : vector<1x128xf32> to vector<24x128xf32>
    %5 = arith.addf %2, %4 : vector<24x128xf32>
    %c0_5 = arith.constant 0 : index
    %c0_6 = arith.constant 0 : index
    %6 = vector.load %arg0[%c0_5, %c0_6] : memref<64x1xi32, #tpu.memory_space<vmem>>, vector<64x1xi32>
    %7 = tpu.iota {dimensions = array<i32: 1>} : vector<64x24xi32>
    %8 = vector.broadcast %6 : vector<64x1xi32> to vector<64x24xi32>
    %9 = arith.cmpi eq, %7, %8 : vector<64x24xi32>
    %10 = arith.extui %9 : vector<64x24xi1> to vector<64x24xi32>
    %11 = arith.sitofp %10 : vector<64x24xi32> to vector<64x24xf32>
    %cst_7 = arith.constant dense<0.000000e+00> : vector<64x128xf32>
    %12 = tpu.matmul %11, %5, %cst_7 {dimension_numbers = #tpu.dot_dimension_numbers<[1], [0], [0], [1], [0, 0, 1, 1], [], []>} : vector<64x24xf32>, vector<24x128xf32>, vector<64x128xf32> -> vector<64x128xf32>
    %c0_8 = arith.constant 0 : index
    %c0_9 = arith.constant 0 : index
    %13 = vector.load %arg4[%c0_8, %c0_9] : memref<32x128xf32, #tpu.memory_space<vmem>>, vector<32x128xf32>
    %14 = tpu.iota {dimensions = array<i32: 1>} : vector<8x128xi32>
    %c64_i32 = arith.constant 64 : i32
    %15 = vector.broadcast %c64_i32 : i32 to vector<8x128xi32>
    %16 = arith.cmpi sge, %14, %15 : vector<8x128xi32>
    %c96_i32 = arith.constant 96 : i32
    %17 = vector.broadcast %c96_i32 : i32 to vector<8x128xi32>
    %18 = arith.cmpi slt, %14, %17 : vector<8x128xi32>
    %19 = arith.andi %16, %18 : vector<8x128xi1>
    %cst_10 = arith.constant 1.000000e+00 : f32
    %cst_11 = arith.constant 5.000000e-01 : f32
    %20 = vector.broadcast %cst_10 : f32 to vector<8x128xf32>
    %21 = vector.broadcast %cst_11 : f32 to vector<8x128xf32>
    %22 = arith.select %19, %20, %21 : vector<8x128xi1>, vector<8x128xf32>
    %cst_12 = arith.constant 0.000000e+00 : f32
    %cst_13 = arith.constant 5.000000e-01 : f32
    %23 = vector.broadcast %cst_12 : f32 to vector<8x128xf32>
    %24 = vector.broadcast %cst_13 : f32 to vector<8x128xf32>
    %25 = arith.select %19, %23, %24 : vector<8x128xi1>, vector<8x128xf32>
    %cst_14 = arith.constant 0.000000e+00 : f32
    %26 = vector.broadcast %cst_14 : f32 to vector<8x32xf32>
    %cst_15 = arith.constant 0.000000e+00 : f32
    %27 = vector.broadcast %cst_15 : f32 to vector<8x32xf32>
    %28 = vector.extract_strided_slice %12 {offsets = [0, 0], sizes = [8, 128], strides = [1, 1]} : vector<64x128xf32> to vector<8x128xf32>
    %cst_16 = arith.constant dense<0.000000e+00> : vector<8x128xf32>
    %29 = tpu.matmul %26, %13, %cst_16 {dimension_numbers = #tpu.dot_dimension_numbers<[1], [0], [0], [1], [0, 0, 1, 1], [], []>} : vector<8x32xf32>, vector<32x128xf32>, vector<8x128xf32> -> vector<8x128xf32>
    %30 = arith.addf %28, %29 : vector<8x128xf32>
    %31 = arith.mulf %30, %22 : vector<8x128xf32>
    %32 = math.tanh %31 : vector<8x128xf32>
    %33 = arith.mulf %32, %22 : vector<8x128xf32>
    %34 = arith.addf %33, %25 : vector<8x128xf32>
    %35 = vector.extract_strided_slice %34 {offsets = [0, 0], sizes = [8, 32], strides = [1, 1]} : vector<8x128xf32> to vector<8x32xf32>
    %36 = vector.extract_strided_slice %34 {offsets = [0, 32], sizes = [8, 32], strides = [1, 1]} : vector<8x128xf32> to vector<8x32xf32>
    %37 = vector.extract_strided_slice %34 {offsets = [0, 64], sizes = [8, 32], strides = [1, 1]} : vector<8x128xf32> to vector<8x32xf32>
    %38 = vector.extract_strided_slice %34 {offsets = [0, 96], sizes = [8, 32], strides = [1, 1]} : vector<8x128xf32> to vector<8x32xf32>
    %39 = arith.mulf %36, %27 : vector<8x32xf32>
    %40 = arith.mulf %35, %37 : vector<8x32xf32>
    %41 = arith.addf %39, %40 : vector<8x32xf32>
    %42 = math.tanh %41 : vector<8x32xf32>
    %43 = arith.mulf %38, %42 : vector<8x32xf32>
    %44 = vector.extract_strided_slice %12 {offsets = [8, 0], sizes = [8, 128], strides = [1, 1]} : vector<64x128xf32> to vector<8x128xf32>
    %cst_17 = arith.constant dense<0.000000e+00> : vector<8x128xf32>
    %45 = tpu.matmul %43, %13, %cst_17 {dimension_numbers = #tpu.dot_dimension_numbers<[1], [0], [0], [1], [0, 0, 1, 1], [], []>} : vector<8x32xf32>, vector<32x128xf32>, vector<8x128xf32> -> vector<8x128xf32>
    %46 = arith.addf %44, %45 : vector<8x128xf32>
    %47 = arith.mulf %46, %22 : vector<8x128xf32>
    %48 = math.tanh %47 : vector<8x128xf32>
    %49 = arith.mulf %48, %22 : vector<8x128xf32>
    %50 = arith.addf %49, %25 : vector<8x128xf32>
    %51 = vector.extract_strided_slice %50 {offsets = [0, 0], sizes = [8, 32], strides = [1, 1]} : vector<8x128xf32> to vector<8x32xf32>
    %52 = vector.extract_strided_slice %50 {offsets = [0, 32], sizes = [8, 32], strides = [1, 1]} : vector<8x128xf32> to vector<8x32xf32>
    %53 = vector.extract_strided_slice %50 {offsets = [0, 64], sizes = [8, 32], strides = [1, 1]} : vector<8x128xf32> to vector<8x32xf32>
    %54 = vector.extract_strided_slice %50 {offsets = [0, 96], sizes = [8, 32], strides = [1, 1]} : vector<8x128xf32> to vector<8x32xf32>
    %55 = arith.mulf %52, %41 : vector<8x32xf32>
    %56 = arith.mulf %51, %53 : vector<8x32xf32>
    %57 = arith.addf %55, %56 : vector<8x32xf32>
    %58 = math.tanh %57 : vector<8x32xf32>
    %59 = arith.mulf %54, %58 : vector<8x32xf32>
    %60 = vector.extract_strided_slice %12 {offsets = [16, 0], sizes = [8, 128], strides = [1, 1]} : vector<64x128xf32> to vector<8x128xf32>
    %cst_18 = arith.constant dense<0.000000e+00> : vector<8x128xf32>
    %61 = tpu.matmul %59, %13, %cst_18 {dimension_numbers = #tpu.dot_dimension_numbers<[1], [0], [0], [1], [0, 0, 1, 1], [], []>} : vector<8x32xf32>, vector<32x128xf32>, vector<8x128xf32> -> vector<8x128xf32>
    %62 = arith.addf %60, %61 : vector<8x128xf32>
    %63 = arith.mulf %62, %22 : vector<8x128xf32>
    %64 = math.tanh %63 : vector<8x128xf32>
    %65 = arith.mulf %64, %22 : vector<8x128xf32>
    %66 = arith.addf %65, %25 : vector<8x128xf32>
    %67 = vector.extract_strided_slice %66 {offsets = [0, 0], sizes = [8, 32], strides = [1, 1]} : vector<8x128xf32> to vector<8x32xf32>
    %68 = vector.extract_strided_slice %66 {offsets = [0, 32], sizes = [8, 32], strides = [1, 1]} : vector<8x128xf32> to vector<8x32xf32>
    %69 = vector.extract_strided_slice %66 {offsets = [0, 64], sizes = [8, 32], strides = [1, 1]} : vector<8x128xf32> to vector<8x32xf32>
    %70 = vector.extract_strided_slice %66 {offsets = [0, 96], sizes = [8, 32], strides = [1, 1]} : vector<8x128xf32> to vector<8x32xf32>
    %71 = arith.mulf %68, %57 : vector<8x32xf32>
    %72 = arith.mulf %67, %69 : vector<8x32xf32>
    %73 = arith.addf %71, %72 : vector<8x32xf32>
    %74 = math.tanh %73 : vector<8x32xf32>
    %75 = arith.mulf %70, %74 : vector<8x32xf32>
    %76 = vector.extract_strided_slice %12 {offsets = [24, 0], sizes = [8, 128], strides = [1, 1]} : vector<64x128xf32> to vector<8x128xf32>
    %cst_19 = arith.constant dense<0.000000e+00> : vector<8x128xf32>
    %77 = tpu.matmul %75, %13, %cst_19 {dimension_numbers = #tpu.dot_dimension_numbers<[1], [0], [0], [1], [0, 0, 1, 1], [], []>} : vector<8x32xf32>, vector<32x128xf32>, vector<8x128xf32> -> vector<8x128xf32>
    %78 = arith.addf %76, %77 : vector<8x128xf32>
    %79 = arith.mulf %78, %22 : vector<8x128xf32>
    %80 = math.tanh %79 : vector<8x128xf32>
    %81 = arith.mulf %80, %22 : vector<8x128xf32>
    %82 = arith.addf %81, %25 : vector<8x128xf32>
    %83 = vector.extract_strided_slice %82 {offsets = [0, 0], sizes = [8, 32], strides = [1, 1]} : vector<8x128xf32> to vector<8x32xf32>
    %84 = vector.extract_strided_slice %82 {offsets = [0, 32], sizes = [8, 32], strides = [1, 1]} : vector<8x128xf32> to vector<8x32xf32>
    %85 = vector.extract_strided_slice %82 {offsets = [0, 64], sizes = [8, 32], strides = [1, 1]} : vector<8x128xf32> to vector<8x32xf32>
    %86 = vector.extract_strided_slice %82 {offsets = [0, 96], sizes = [8, 32], strides = [1, 1]} : vector<8x128xf32> to vector<8x32xf32>
    %87 = arith.mulf %84, %73 : vector<8x32xf32>
    %88 = arith.mulf %83, %85 : vector<8x32xf32>
    %89 = arith.addf %87, %88 : vector<8x32xf32>
    %90 = math.tanh %89 : vector<8x32xf32>
    %91 = arith.mulf %86, %90 : vector<8x32xf32>
    %92 = vector.extract_strided_slice %12 {offsets = [32, 0], sizes = [8, 128], strides = [1, 1]} : vector<64x128xf32> to vector<8x128xf32>
    %cst_20 = arith.constant dense<0.000000e+00> : vector<8x128xf32>
    %93 = tpu.matmul %91, %13, %cst_20 {dimension_numbers = #tpu.dot_dimension_numbers<[1], [0], [0], [1], [0, 0, 1, 1], [], []>} : vector<8x32xf32>, vector<32x128xf32>, vector<8x128xf32> -> vector<8x128xf32>
    %94 = arith.addf %92, %93 : vector<8x128xf32>
    %95 = arith.mulf %94, %22 : vector<8x128xf32>
    %96 = math.tanh %95 : vector<8x128xf32>
    %97 = arith.mulf %96, %22 : vector<8x128xf32>
    %98 = arith.addf %97, %25 : vector<8x128xf32>
    %99 = vector.extract_strided_slice %98 {offsets = [0, 0], sizes = [8, 32], strides = [1, 1]} : vector<8x128xf32> to vector<8x32xf32>
    %100 = vector.extract_strided_slice %98 {offsets = [0, 32], sizes = [8, 32], strides = [1, 1]} : vector<8x128xf32> to vector<8x32xf32>
    %101 = vector.extract_strided_slice %98 {offsets = [0, 64], sizes = [8, 32], strides = [1, 1]} : vector<8x128xf32> to vector<8x32xf32>
    %102 = vector.extract_strided_slice %98 {offsets = [0, 96], sizes = [8, 32], strides = [1, 1]} : vector<8x128xf32> to vector<8x32xf32>
    %103 = arith.mulf %100, %89 : vector<8x32xf32>
    %104 = arith.mulf %99, %101 : vector<8x32xf32>
    %105 = arith.addf %103, %104 : vector<8x32xf32>
    %106 = math.tanh %105 : vector<8x32xf32>
    %107 = arith.mulf %102, %106 : vector<8x32xf32>
    %108 = vector.extract_strided_slice %12 {offsets = [40, 0], sizes = [8, 128], strides = [1, 1]} : vector<64x128xf32> to vector<8x128xf32>
    %cst_21 = arith.constant dense<0.000000e+00> : vector<8x128xf32>
    %109 = tpu.matmul %107, %13, %cst_21 {dimension_numbers = #tpu.dot_dimension_numbers<[1], [0], [0], [1], [0, 0, 1, 1], [], []>} : vector<8x32xf32>, vector<32x128xf32>, vector<8x128xf32> -> vector<8x128xf32>
    %110 = arith.addf %108, %109 : vector<8x128xf32>
    %111 = arith.mulf %110, %22 : vector<8x128xf32>
    %112 = math.tanh %111 : vector<8x128xf32>
    %113 = arith.mulf %112, %22 : vector<8x128xf32>
    %114 = arith.addf %113, %25 : vector<8x128xf32>
    %115 = vector.extract_strided_slice %114 {offsets = [0, 0], sizes = [8, 32], strides = [1, 1]} : vector<8x128xf32> to vector<8x32xf32>
    %116 = vector.extract_strided_slice %114 {offsets = [0, 32], sizes = [8, 32], strides = [1, 1]} : vector<8x128xf32> to vector<8x32xf32>
    %117 = vector.extract_strided_slice %114 {offsets = [0, 64], sizes = [8, 32], strides = [1, 1]} : vector<8x128xf32> to vector<8x32xf32>
    %118 = vector.extract_strided_slice %114 {offsets = [0, 96], sizes = [8, 32], strides = [1, 1]} : vector<8x128xf32> to vector<8x32xf32>
    %119 = arith.mulf %116, %105 : vector<8x32xf32>
    %120 = arith.mulf %115, %117 : vector<8x32xf32>
    %121 = arith.addf %119, %120 : vector<8x32xf32>
    %122 = math.tanh %121 : vector<8x32xf32>
    %123 = arith.mulf %118, %122 : vector<8x32xf32>
    %124 = vector.extract_strided_slice %12 {offsets = [48, 0], sizes = [8, 128], strides = [1, 1]} : vector<64x128xf32> to vector<8x128xf32>
    %cst_22 = arith.constant dense<0.000000e+00> : vector<8x128xf32>
    %125 = tpu.matmul %123, %13, %cst_22 {dimension_numbers = #tpu.dot_dimension_numbers<[1], [0], [0], [1], [0, 0, 1, 1], [], []>} : vector<8x32xf32>, vector<32x128xf32>, vector<8x128xf32> -> vector<8x128xf32>
    %126 = arith.addf %124, %125 : vector<8x128xf32>
    %127 = arith.mulf %126, %22 : vector<8x128xf32>
    %128 = math.tanh %127 : vector<8x128xf32>
    %129 = arith.mulf %128, %22 : vector<8x128xf32>
    %130 = arith.addf %129, %25 : vector<8x128xf32>
    %131 = vector.extract_strided_slice %130 {offsets = [0, 0], sizes = [8, 32], strides = [1, 1]} : vector<8x128xf32> to vector<8x32xf32>
    %132 = vector.extract_strided_slice %130 {offsets = [0, 32], sizes = [8, 32], strides = [1, 1]} : vector<8x128xf32> to vector<8x32xf32>
    %133 = vector.extract_strided_slice %130 {offsets = [0, 64], sizes = [8, 32], strides = [1, 1]} : vector<8x128xf32> to vector<8x32xf32>
    %134 = vector.extract_strided_slice %130 {offsets = [0, 96], sizes = [8, 32], strides = [1, 1]} : vector<8x128xf32> to vector<8x32xf32>
    %135 = arith.mulf %132, %121 : vector<8x32xf32>
    %136 = arith.mulf %131, %133 : vector<8x32xf32>
    %137 = arith.addf %135, %136 : vector<8x32xf32>
    %138 = math.tanh %137 : vector<8x32xf32>
    %139 = arith.mulf %134, %138 : vector<8x32xf32>
    %140 = vector.extract_strided_slice %12 {offsets = [56, 0], sizes = [8, 128], strides = [1, 1]} : vector<64x128xf32> to vector<8x128xf32>
    %cst_23 = arith.constant dense<0.000000e+00> : vector<8x128xf32>
    %141 = tpu.matmul %139, %13, %cst_23 {dimension_numbers = #tpu.dot_dimension_numbers<[1], [0], [0], [1], [0, 0, 1, 1], [], []>} : vector<8x32xf32>, vector<32x128xf32>, vector<8x128xf32> -> vector<8x128xf32>
    %142 = arith.addf %140, %141 : vector<8x128xf32>
    %143 = arith.mulf %142, %22 : vector<8x128xf32>
    %144 = math.tanh %143 : vector<8x128xf32>
    %145 = arith.mulf %144, %22 : vector<8x128xf32>
    %146 = arith.addf %145, %25 : vector<8x128xf32>
    %147 = vector.extract_strided_slice %146 {offsets = [0, 0], sizes = [8, 32], strides = [1, 1]} : vector<8x128xf32> to vector<8x32xf32>
    %148 = vector.extract_strided_slice %146 {offsets = [0, 32], sizes = [8, 32], strides = [1, 1]} : vector<8x128xf32> to vector<8x32xf32>
    %149 = vector.extract_strided_slice %146 {offsets = [0, 64], sizes = [8, 32], strides = [1, 1]} : vector<8x128xf32> to vector<8x32xf32>
    %150 = vector.extract_strided_slice %146 {offsets = [0, 96], sizes = [8, 32], strides = [1, 1]} : vector<8x128xf32> to vector<8x32xf32>
    %151 = arith.mulf %148, %137 : vector<8x32xf32>
    %152 = arith.mulf %147, %149 : vector<8x32xf32>
    %153 = arith.addf %151, %152 : vector<8x32xf32>
    %154 = math.tanh %153 : vector<8x32xf32>
    %155 = arith.mulf %150, %154 : vector<8x32xf32>
    %156 = tpu.concatenate %43, %59, %75, %91, %107, %123, %139, %155 in 0 : vector<8x32xf32>, vector<8x32xf32>, vector<8x32xf32>, vector<8x32xf32>, vector<8x32xf32>, vector<8x32xf32>, vector<8x32xf32>, vector<8x32xf32> -> vector<64x32xf32>
    %c0_24 = arith.constant 0 : index
    %c0_25 = arith.constant 0 : index
    %157 = vector.load %arg5[%c0_24, %c0_25] : memref<32x128xf32, #tpu.memory_space<vmem>>, vector<32x128xf32>
    %cst_26 = arith.constant dense<0.000000e+00> : vector<64x128xf32>
    %158 = tpu.matmul %156, %157, %cst_26 {dimension_numbers = #tpu.dot_dimension_numbers<[1], [0], [0], [1], [0, 0, 1, 1], [], []>} : vector<64x32xf32>, vector<32x128xf32>, vector<64x128xf32> -> vector<64x128xf32>
    %c0_27 = arith.constant 0 : index
    %c0_28 = arith.constant 0 : index
    %159 = vector.load %arg6[%c0_27, %c0_28] : memref<1x128xf32, #tpu.memory_space<vmem>>, vector<1x128xf32>
    %160 = vector.broadcast %159 : vector<1x128xf32> to vector<64x128xf32>
    %161 = arith.addf %158, %160 : vector<64x128xf32>
    %cst_29 = arith.constant dense<0xFF800000> : vector<64xf32>
    %162 = vector.multi_reduction <maximumf>, %161, %cst_29 [1] : vector<64x128xf32> to vector<64xf32>
    %163 = vector.shape_cast %162 : vector<64xf32> to vector<64x1xf32>
    %164 = vector.broadcast %163 : vector<64x1xf32> to vector<64x128xf32>
    %165 = arith.subf %161, %164 : vector<64x128xf32>
    %166 = math.exp %165 : vector<64x128xf32>
    %cst_30 = arith.constant dense<0.000000e+00> : vector<64xf32>
    %167 = vector.multi_reduction <add>, %166, %cst_30 [1] : vector<64x128xf32> to vector<64xf32>
    %168 = vector.shape_cast %167 : vector<64xf32> to vector<64x1xf32>
    %169 = math.log %168 : vector<64x1xf32>
    %170 = vector.broadcast %169 : vector<64x1xf32> to vector<64x128xf32>
    %171 = arith.subf %165, %170 : vector<64x128xf32>
    %c0_31 = arith.constant 0 : index
    %c0_32 = arith.constant 0 : index
    %172 = vector.load %arg7[%c0_31, %c0_32] : memref<64x128xf32, #tpu.memory_space<vmem>>, vector<64x128xf32>
    tpu.vector_store %arg7[%c0_31, %c0_32], %171 {strides = array<i32>} : memref<64x128xf32, #tpu.memory_space<vmem>>, vector<64x128xf32>,
    return
  }
}

</mosaic_0001>

<bundles_post_ra>
// kernel: tpu_custom_call.1
= control target key start
LH: loop header
LB: loop body
LE: loop exit
PB: predicated region body
PF: predicated region fallthrough
CT: control target
= control target key end

     0   :  { %12 = vsyncpa [#allocation3], 0  ;;  %s2198_s0 = inlined_call_operand.vmem [shape: s32[64,1], index: 0, kind: input, shape index: {}]   ;;  %s2199_s1 = inlined_call_operand.hbm [shape: f32[24,32], index: 1, kind: input, shape index: {}]   ;;  %s2200_s2 = inlined_call_operand.vmem [shape: f32[32,128], index: 2, kind: input, shape index: {}]   ;;  %s2201_s3 = inlined_call_operand.vmem [shape: f32[1,128], index: 3, kind: input, shape index: {}]   ;;  %s2202_s4 = inlined_call_operand.vmem [shape: f32[32,128], index: 4, kind: input, shape index: {}]   ;;  %s2203_s5 = inlined_call_operand.hbm [shape: f32[32,128], index: 5, kind: input, shape index: {}]   ;;  %s2204_s6 = inlined_call_operand.vmem [shape: f32[1,128], index: 6, kind: input, shape index: {}]   ;;  %s2205_s7 = inlined_call_operand.hbm [shape: f32[64,128], index: 7, kind: output, shape index: {}]  }
   0x1   :  { %13 = vsyncpa [#allocation6], 0 }
   0x2   :  { %14 = vsyncpa [#allocation4], 0  ;;  %s1822_s24 = smov [#allocation2]   ;;  %s1750_s28 = scalar_lea.hbm %s2199_s1, 384 }
   0x3   :  { %s22_s25 = sshll.u32 %s1822_s24, 4  ;;  %p1751_p0 = scmp.ne.s32.totalorder %s2199_s1, %s1750_s28  ;;  %s23_s25 = int_to_ptr.vmem [resolvable:$true] %s22_s25 }
   0x4   :  { %p1754_p1 = scmp.lt.u32.totalorder %s1750_s28, %s2199_s1 }
   0x6   :  { %p1756_p2 = pnand %p1754_p1, %p1751_p0 }
   0x8   :  { %1759 = shalt.err (!%p1756_p2)
}
   0x9   :  { %s1760_s10 = scalar_lea.vmem %s23_s25, 384  ;;  %p1765_p4 = scmp.lt.s32.totalorder %s23_s25, %s23_s25 }
   0xa   :  { %p1761_p3 = scmp.ne.s32.totalorder %s23_s25, %s1760_s10  ;;  %p1766_p5 = scmp.lt.s32.totalorder %s1760_s10, %s1760_s10 }
   0xc   :  { %p1767_p6 = por %p1766_p5, %p1765_p4 }
   0xe   :  { %p1768_p7 = pnand %p1767_p6, %p1761_p3 }
  0x10   :  { %1771 = shalt.err (!%p1768_p7)
}
  0x11   :  { %s1823_s11 = smov 128   ;;  %s1824_s12 = smov 8  }
  0x12   :  { %28 = dma.hbm_to_vmem [thread:$0]  %s2199_s1, 384, %s23_s25, [#allocation3], %s1823_s11, %s1823_s11, %s1824_s12  }
  0x13   :  { %s1825_s15 = smov [#allocation5]   ;;  %s1772_s19 = scalar_lea.hbm %s2203_s5, 512 }
  0x14   :  { %s40_s16 = sshll.u32 %s1825_s15, 4  ;;  %p1773_p8 = scmp.ne.s32.totalorder %s2203_s5, %s1772_s19  ;;  %s41_s16 = int_to_ptr.vmem [resolvable:$true] %s40_s16 }
  0x15   :  { %p1776_p9 = scmp.lt.u32.totalorder %s1772_s19, %s2203_s5 }
  0x17   :  { %p1778_p10 = pnand %p1776_p9, %p1773_p8 }
  0x19   :  { %1781 = shalt.err (!%p1778_p10)
}
  0x1a   :  { %s1782_s24 = scalar_lea.vmem %s41_s16, 512  ;;  %p1787_p12 = scmp.lt.s32.totalorder %s41_s16, %s41_s16 }
  0x1b   :  { %p1783_p11 = scmp.ne.s32.totalorder %s41_s16, %s1782_s24  ;;  %p1788_p13 = scmp.lt.s32.totalorder %s1782_s24, %s1782_s24 }
  0x1d   :  { %p1789_p0 = por %p1788_p13, %p1787_p12 }
  0x1f   :  { %p1790_p1 = pnand %p1789_p0, %p1783_p11 }
  0x21   :  { %1793 = shalt.err (!%p1790_p1)
}
  0x22   :  { %46 = dma.hbm_to_vmem [thread:$0]  %s2203_s5, 512, %s41_s16, [#allocation6], %s1823_s11, %s1823_s11, %s1824_s12  }
  0x23   :  { %1816 = dma.done.wait [#allocation3], 384  }
  0x24   :  { %1817 = vsyncadd [#allocation3], 4294966912 }
  0x25   :  { %1818 = dma.done.wait [#allocation6], 512  }
  0x26   :  { %1819 = vsyncadd [#allocation6], 4294966784  ;;  %v1826_v0 = vmov 0.0|0.0   ;;  %vm1827_vm0 = vmmov 0   ;;  %v1828_v1 = vmov 0.0   ;;  %v1829_v2 = vmov 0  }
  0x27   :  { %1606 = vmatprep.subr.bf16.mxu0 %v1826_v0  ;;  %1471 = vmatprep.mubr.msk.f32.mxu0 %vm1827_vm0, %v1828_v1  ;;  %v58_v3 = vld [vmem:[%s2200_s2] sm:$0xff]  ;;  %v59_v4 = vld [vmem:[%s2200_s2 + $0x8] sm:$0xff]  ;;  %v60_v5 = vld [vmem:[%s2200_s2 + $0x10] sm:$0xff]  ;;  %vm69_vm1 = vcmask 261120   ;;  %v167_v26 = vlaneseq  ;;  %vm217_vm2 = vcmask 195584   ;;  %v1830_v63 = vmov 0.5  }
  0x28   :  { %1684 = vset.pattern.permute.xlu0 %v1829_v2  ;;  %1685 = vset.pattern.permute.xlu1 %v1829_v2  ;;  %v1607_v6 = vpack.c.bf16 %v59_v4, %v58_v3  ;;  %v61_v7 = vld [vmem:[%s2200_s2 + $0x18] sm:$0xff]  ;;  %v159_v8 = vld [vmem:[%s2198_s0] sm:$0xff]  ;;  %v161_v9 = vld [vmem:[%s2198_s0 + $0x10] sm:$0xff]  ;;  %s1832_s10 = smov 32  }
  0x29   :  { %v1610_v10 = vpack.c.bf16 %v61_v7, %v60_v5  ;;  %170 = vperm.xlu0 %1684, %v159_v8   ;;  %176 = vperm.xlu1 %1685, %v161_v9   ;;  %v160_v11 = vld [vmem:[%s2198_s0 + $0x8] sm:$0xff]  ;;  %v162_v12 = vld [vmem:[%s2198_s0 + $0x18] sm:$0xff]  ;;  %v55_v13 = vld [vmem:[#allocation2] sm:$0xff]  ;;  %v1974_v27 = vand.u32 127, %v167_v26 }
  0x2a   :  { %1608 = vmatpush3.bf16.msra.mxu0 %v1607_v6  ;;  %v163_v14 = vld [vmem:[%s2198_s0 + $0x20] sm:$0xff]  ;;  %v164_v15 = vld [vmem:[%s2198_s0 + $0x28] sm:$0xff]  ;;  %v165_v17 = vld [vmem:[%s2198_s0 + $0x30] sm:$0xff] }
  0x2b   :  { %1609 = vmatprep.subr.bf16.mxu0 %v1826_v0  ;;  %v56_v16 = vld [vmem:[#allocation2 + $0x8] sm:$0xff]  ;;  %v166_v18 = vld [vmem:[%s2198_s0 + $0x38] sm:$0xff]  ;;  %v57_v19 = vld [vmem:[#allocation2 + $0x10] sm:$0xff]  ;;  %vm351_vm11 = vcmp.ge.s32.totalorder %v1974_v27, 64  ;;  %vm352_vm12 = vcmp.lt.s32.totalorder %v1974_v27, 96 }
  0x2c   :  { %v347_v20 = vld [vmem:[%s2202_s4] sm:$0xff]  ;;  %v348_v21 = vld [vmem:[%s2202_s4 + $0x8] sm:$0xff]  ;;  %v349_v23 = vld [vmem:[%s2202_s4 + $0x10] sm:$0xff] }
  0x2d   :  { %173 = vperm.xlu0 %1684, %v160_v11   ;;  %179 = vperm.xlu1 %1685, %v162_v12   ;;  %v1960_v22 = vpack.c.bf16 %v348_v21, %v347_v20  ;;  %v350_v24 = vld [vmem:[%s2202_s4 + $0x18] sm:$0xff]  ;;  %v1357_v32 = vld [vmem:[%s2201_s3] ss:$0 sm:$0xff]  ;;  %vm353_vm13 = vmand %vm351_vm11, %vm352_vm12  ;;  %s1831_s3 = smov 64  }
  0x2e   :  { %1611 = vmatpush3.bf16.msra.mxu0 %v1610_v10  ;;  %v1970_v25 = vpack.c.bf16 %v350_v24, %v349_v23  ;;  %v2031_v2 = vsel %vm353_vm13, 1.0, %v1830_v63  ;;  %v2034_v8 = vsel %vm353_vm13, 0.0, %v1830_v63 }
  0x2f   :  { %1628 = vmatprep.subr.bf16.mxu0 %v1826_v0 }
  0x31   :  { %1472 = vmatmul.mubr.msk.f32.vlgmr.msra.gmra.mrb[0].mxu0 %vm69_vm1, %v55_v13  ;;  %182 = vperm.xlu0 %1684, %v163_v14  }
  0x32   :  { %1474 = vmatprep.mubr.msk.f32.mxu0 %vm1827_vm0, %v1828_v1  ;;  %185 = vperm.xlu1 %1685, %v164_v15  }
  0x33   :  { %1630 = vmatpush3.bf16.msra.mxu0 %v1960_v22 }
  0x34   :  { %1631 = vmatprep.subr.bf16.mxu0 %v1826_v0 }
  0x35   :  { %1475 = vmatmul.mubr.msk.f32.gmra.mrb[2].mxu0 %vm69_vm1, %v56_v16  ;;  %188 = vperm.xlu0 %1684, %v165_v17  }
  0x36   :  { %1477 = vmatprep.mubr.msk.f32.mxu0 %vm1827_vm0, %v1828_v1  ;;  %191 = vperm.xlu1 %1685, %v166_v18  }
  0x37   :  { %1633 = vmatpush3.bf16.msra.mxu0 %v1970_v25 }
  0x38   :  { %1640 = vmatprep.subr.bf16.mxu0 %v1826_v0 }
  0x39   :  { %1478 = vmatmul.mubr.msk.f32.gmra.mrb[4].mxu0 %vm69_vm1, %v57_v19 }
  0x3a   :  { %1528 = vmatprep.mubr.msk.f32.mxu0 %vm1827_vm0, %v1828_v1 }
  0xa8   :  { %v171_v28 = vpop.permute.xlu0 %170  ;;  %v177_v33 = vpop.permute.xlu1 %176 }
  0xa9   :  { %vm193_vm3 = vcmp.eq.s32.totalorder %v1974_v27, %v171_v28  ;;  %vm195_vm4 = vcmp.eq.s32.totalorder %v1974_v27, %v177_v33 }
  0xaa   :  { %v1361_v29 = vsel %vm193_vm3, 1.0, %v1828_v1  ;;  %v1363_v45 = vsel %vm195_vm4, 1.0, %v1828_v1 }
  0xab   :  { %1486 = vmatprep.mubr.msk.f32.mxu1 %vm217_vm2, %v1361_v29 }
  0xac   :  { %v174_v36 = vpop.permute.xlu0 %173  ;;  %v180_v40 = vpop.permute.xlu1 %179 }
  0xad   :  { %vm194_vm5 = vcmp.eq.s32.totalorder %v1974_v27, %v174_v36  ;;  %vm196_vm6 = vcmp.eq.s32.totalorder %v1974_v27, %v180_v40 }
  0xae   :  { %v1362_v46 = vsel %vm194_vm5, 1.0, %v1828_v1  ;;  %v1364_v49 = vsel %vm196_vm6, 1.0, %v1828_v1 }
  0xb0   :  { %v183_v44 = vpop.permute.xlu0 %182 }
  0xb1   :  { %v186_v47 = vpop.permute.xlu1 %185  ;;  %vm197_vm7 = vcmp.eq.s32.totalorder %v1974_v27, %v183_v44 }
  0xb2   :  { %v1365_v50 = vsel %vm197_vm7, 1.0, %v1828_v1  ;;  %vm198_vm8 = vcmp.eq.s32.totalorder %v1974_v27, %v186_v47 }
  0xb3   :  { %v1366_v52 = vsel %vm198_vm8, 1.0, %v1828_v1 }
  0xb4   :  { %v189_v48 = vpop.permute.xlu0 %188 }
  0xb5   :  { %vm199_vm9 = vcmp.eq.s32.totalorder %v1974_v27, %v189_v48  ;;  %v192_v51 = vpop.permute.xlu1 %191 }
  0xb6   :  { %v1367_v53 = vsel %vm199_vm9, 1.0, %v1828_v1  ;;  %vm200_vm10 = vcmp.eq.s32.totalorder %v1974_v27, %v192_v51 }
  0xb7   :  { %v1368_v54 = vsel %vm200_vm10, 1.0, %v1828_v1 }
 0x104   :  { %v145_v30 = vpop.f32.mrb[0].mxu0 }
 0x105   :  { %v1473_v31 = vpop.f32.mrb[1].mxu0  ;;  %v146_v35 = vadd.f32 %v1357_v32, %v145_v30 }
 0x108   :  { %v150_v34 = vpop.f32.mrb[2].mxu0 }
 0x109   :  { %v151_v37 = vadd.f32 %v1357_v32, %v150_v34  ;;  %v1476_v38 = vpop.f32.mrb[3].mxu0 }
 0x10b   :  { %v1612_v39 = vpack.c.bf16 %v151_v37, %v146_v35 }
 0x10c   :  { %v155_v41 = vpop.f32.mrb[4].mxu0 }
 0x10d   :  { %v156_v42 = vadd.f32 %v1357_v32, %v155_v41  ;;  %1613 = vmatprep.subr.bf16.mxu1 %v1612_v39  ;;  %v1479_v43 = vpop.f32.mrb[5].mxu0 }
 0x10e   :  { %1615 = vmatpush3.bf16.msra.mxu1 %v1612_v39 }
 0x10f   :  { %1484 = vmatprep.subr.mxu1 %v156_v42 }
 0x112   :  { %1485 = vmatpush3.msra.mxu1 %v156_v42 }
 0x113   :  { %1487 = vmatmul.mubr.msk.f32.vlgmr.msra.gmra.mrb[0].mxu1 %vm217_vm2, %v1362_v46  ;;  %1616 = vmatprep.subr.bf16.mxu1 %v1826_v0 }
 0x114   :  { %1489 = vmatprep.mubr.msk.f32.mxu1 %vm217_vm2, %v1363_v45  ;;  %1618 = vmatpush3.bf16.msra.mxu1 %v1960_v22 }
 0x115   :  { %1619 = vmatprep.subr.bf16.mxu1 %v1826_v0 }
 0x117   :  { %1490 = vmatmul.mubr.msk.f32.gmra.mrb[2].mxu1 %vm217_vm2, %v1364_v49 }
 0x118   :  { %1492 = vmatprep.mubr.msk.f32.mxu1 %vm217_vm2, %v1365_v50  ;;  %1621 = vmatpush3.bf16.msra.mxu1 %v1970_v25 }
 0x119   :  { %1622 = vmatprep.subr.bf16.mxu1 %v1826_v0 }
 0x11b   :  { %1493 = vmatmul.mubr.msk.f32.gmra.mrb[4].mxu1 %vm217_vm2, %v1366_v52 }
 0x11c   :  { %1495 = vmatprep.mubr.msk.f32.mxu1 %vm217_vm2, %v1367_v53 }
 0x11f   :  { %1496 = vmatmul.mubr.msk.f32.gmra.mrb[6].mxu1 %vm217_vm2, %v1368_v54 }
 0x120   :  { %1506 = vmatprep.mubr.msk.f32.mxu1 %vm1827_vm0, %v1828_v1 }
 0x123   :  { %1507 = vmatmul.mubr.f32.vlgmr.msra.gmra.mrb[8].mxu1 %v1828_v1 }
 0x124   :  { %1624 = vmatpush3.bf16.msra.mxu1 %v1960_v22  ;;  %1517 = vmatprep.mubr.msk.f32.mxu1 %vm1827_vm0, %v1828_v1 }
 0x125   :  { %1625 = vmatprep.subr.bf16.mxu1 %v1826_v0 }
 0x128   :  { %1627 = vmatpush3.bf16.msra.mxu1 %v1970_v25 }
 0x129   :  { %1634 = vmatprep.subr.bf16.mxu1 %v1826_v0 }
 0x1e6   :  { %v1488_v55 = vpop.f32.mrb[0].mxu1 }
 0x1e7   :  { %v308_v56 = vpop.f32.mrb[1].mxu1 }
 0x1ea   :  { %v2017_v57 = vpop.f32.mrb[2].mxu1 }
 0x1eb   :  { %v2019_v58 = vpop.f32.mrb[3].mxu1 }
 0x1ee   :  { %v2021_v59 = vpop.f32.mrb[4].mxu1 }
 0x1ef   :  { %v2023_v60 = vpop.f32.mrb[5].mxu1 }
 0x1f2   :  { %v2027_v61 = vpop.f32.mrb[6].mxu1 }
 0x1f3   :  { %v2029_v62 = vpop.f32.mrb[7].mxu1 }
 0x1f6   :  { %v425_v3 = vpop.f32.mrb[8].mxu1 }
 0x1f7   :  { %v429_v4 = vadd.f32 %v425_v3, %v308_v56  ;;  %v1508_v5 = vpop.f32.mrb[9].mxu1 }
 0x1f9   :  { %v430_v6 = vmul.f32 %v429_v4, %v2031_v2 }
 0x1fb   :  { %1686 = vtanh.f32 %v430_v6 }
 0x205   :  { %v1687_v7 = vpop.eup %1686 }
 0x206   :  { %v432_v9 = vmul.f32 %v1687_v7, %v2031_v2 }
 0x208   :  { %v433_v10 = vadd.f32 %v432_v9, %v2034_v8 }
 0x20a   :  { %436 = vrot.lane.b32.xlu0 %v433_v10, %s1831_s3  ;;  %v434_v13 = vmul.f32 0.0, %v433_v10 }
 0x27c   :  { %v437_v11 = vpop.permute.xlu0 %436 }
 0x27d   :  { %v439_v12 = vmul.f32 %v437_v11, %v433_v10 }
 0x27f   :  { %441 = vrot.lane.b32.xlu1 %v439_v12, %s1832_s10 }
 0x2f1   :  { %v442_v14 = vpop.permute.xlu1 %441 }
 0x2f2   :  { %v444_v15 = vadd.f32 %v442_v14, %v434_v13 }
 0x2f4   :  { %1688 = vtanh.f32 %v444_v15 }
 0x2fe   :  { %v1689_v16 = vpop.eup %1688 }
 0x2ff   :  { %447 = vrot.lane.b32.xlu0 %v1689_v16, %s1831_s3 }
 0x371   :  { %v448_v17 = vpop.permute.xlu0 %447 }
 0x372   :  { %v450_v18 = vmul.f32 %v448_v17, %v433_v10 }
 0x374   :  { %452 = vrot.lane.b32.xlu1 %v450_v18, %s1832_s10 }
 0x3e6   :  { %v2042_v19 = vpop.permute.xlu1 %452 }
 0x3e7   :  { %1518 = vmatmul.mubr.msk.f32.vlgmr.msra.gmra.mrb[10].mxu1 %vm69_vm1, %v2042_v19 }
 0x3e8   :  { %1636 = vmatpush3.bf16.msra.mxu1 %v1960_v22  ;;  %1539 = vmatprep.mubr.msk.f32.mxu1 %vm1827_vm0, %v1828_v1 }
 0x3e9   :  { %1637 = vmatprep.subr.bf16.mxu1 %v1826_v0 }
 0x3ec   :  { %1639 = vmatpush3.bf16.msra.mxu1 %v1970_v25 }
 0x3ed   :  { %1646 = vmatprep.subr.bf16.mxu1 %v1826_v0 }
 0x4ba   :  { %v522_v20 = vpop.f32.mrb[10].mxu1 }
 0x4bb   :  { %v526_v21 = vadd.f32 %v1488_v55, %v522_v20  ;;  %v1519_v23 = vpop.f32.mrb[11].mxu1 }
 0x4bd   :  { %v527_v24 = vmul.f32 %v526_v21, %v2031_v2 }
 0x4bf   :  { %1690 = vtanh.f32 %v527_v24 }
 0x4c9   :  { %v1691_v26 = vpop.eup %1690 }
 0x4ca   :  { %v529_v27 = vmul.f32 %v1691_v26, %v2031_v2 }
 0x4cc   :  { %v530_v28 = vadd.f32 %v529_v27, %v2034_v8 }
 0x4ce   :  { %533 = vrot.lane.b32.xlu0 %v530_v28, %s1831_s3  ;;  %v531_v31 = vmul.f32 %v530_v28, %v444_v15 }
 0x540   :  { %v534_v29 = vpop.permute.xlu0 %533 }
 0x541   :  { %v536_v30 = vmul.f32 %v534_v29, %v530_v28 }
 0x543   :  { %538 = vrot.lane.b32.xlu1 %v536_v30, %s1832_s10 }
 0x5b5   :  { %v539_v32 = vpop.permute.xlu1 %538 }
 0x5b6   :  { %v541_v33 = vadd.f32 %v539_v32, %v531_v31 }
 0x5b8   :  { %1692 = vtanh.f32 %v541_v33 }
 0x5c2   :  { %v1693_v34 = vpop.eup %1692 }
 0x5c3   :  { %544 = vrot.lane.b32.xlu0 %v1693_v34, %s1831_s3 }
 0x635   :  { %v545_v35 = vpop.permute.xlu0 %544 }
 0x636   :  { %v547_v36 = vmul.f32 %v545_v35, %v530_v28 }
 0x638   :  { %549 = vrot.lane.b32.xlu1 %v547_v36, %s1832_s10 }
 0x6aa   :  { %v2059_v37 = vpop.permute.xlu1 %549 }
 0x6ab   :  { %1529 = vmatmul.mubr.msk.f32.vlgmr.msra.gmra.mrb[6].mxu0 %vm69_vm1, %v2059_v37 }
 0x6ac   :  { %1642 = vmatpush3.bf16.msra.mxu0 %v1960_v22  ;;  %1550 = vmatprep.mubr.msk.f32.mxu0 %vm1827_vm0, %v1828_v1 }
 0x6ad   :  { %1643 = vmatprep.subr.bf16.mxu0 %v1826_v0 }
 0x6b0   :  { %1645 = vmatpush3.bf16.msra.mxu0 %v1970_v25 }
 0x6b1   :  { %1652 = vmatprep.subr.bf16.mxu0 %v1826_v0 }
 0x77e   :  { %v619_v38 = vpop.f32.mrb[6].mxu0 }
 0x77f   :  { %v623_v39 = vadd.f32 %v619_v38, %v2019_v58  ;;  %v1530_v40 = vpop.f32.mrb[7].mxu0 }
 0x781   :  { %v624_v41 = vmul.f32 %v623_v39, %v2031_v2 }
 0x783   :  { %1694 = vtanh.f32 %v624_v41  ;;  %v1131_v41 = vld [vmem:[#allocation5 + $0x8] sm:$0xff] }
 0x78d   :  { %v1695_v42 = vpop.eup %1694 }
 0x78e   :  { %v626_v43 = vmul.f32 %v1695_v42, %v2031_v2 }
 0x790   :  { %v627_v44 = vadd.f32 %v626_v43, %v2034_v8 }
 0x792   :  { %630 = vrot.lane.b32.xlu0 %v627_v44, %s1831_s3  ;;  %v628_v47 = vmul.f32 %v627_v44, %v541_v33 }
 0x804   :  { %v631_v45 = vpop.permute.xlu0 %630 }
 0x805   :  { %v633_v46 = vmul.f32 %v631_v45, %v627_v44 }
 0x807   :  { %635 = vrot.lane.b32.xlu1 %v633_v46, %s1832_s10  ;;  %v1132_v46 = vld [vmem:[#allocation5 + $0x10] sm:$0xff] }
 0x879   :  { %v636_v48 = vpop.permute.xlu1 %635 }
 0x87a   :  { %v638_v49 = vadd.f32 %v636_v48, %v628_v47  ;;  %v1133_v47 = vld [vmem:[#allocation5 + $0x18] sm:$0xff] }
 0x87b   :  { %v1668_v48 = vpack.c.bf16 %v1133_v47, %v1132_v46 }
 0x87c   :  { %1696 = vtanh.f32 %v638_v49 }
 0x886   :  { %v1697_v50 = vpop.eup %1696 }
 0x887   :  { %641 = vrot.lane.b32.xlu0 %v1697_v50, %s1831_s3 }
 0x8f9   :  { %v642_v51 = vpop.permute.xlu0 %641 }
 0x8fa   :  { %v644_v52 = vmul.f32 %v642_v51, %v627_v44 }
 0x8fc   :  { %646 = vrot.lane.b32.xlu1 %v644_v52, %s1832_s10 }
 0x96e   :  { %v2077_v53 = vpop.permute.xlu1 %646 }
 0x96f   :  { %1540 = vmatmul.mubr.msk.f32.vlgmr.msra.gmra.mrb[12].mxu1 %vm69_vm1, %v2077_v53 }
 0x970   :  { %1648 = vmatpush3.bf16.msra.mxu1 %v1960_v22  ;;  %1561 = vmatprep.mubr.msk.f32.mxu1 %vm1827_vm0, %v1828_v1 }
 0x971   :  { %1649 = vmatprep.subr.bf16.mxu1 %v1826_v0 }
 0x974   :  { %1651 = vmatpush3.bf16.msra.mxu1 %v1970_v25 }
 0x975   :  { %1658 = vmatprep.subr.bf16.mxu1 %v1826_v0 }
 0xa42   :  { %v716_v54 = vpop.f32.mrb[12].mxu1 }
 0xa43   :  { %v720_v55 = vadd.f32 %v2017_v57, %v716_v54  ;;  %v1541_v56 = vpop.f32.mrb[13].mxu1 }
 0xa45   :  { %v721_v58 = vmul.f32 %v720_v55, %v2031_v2 }
 0xa47   :  { %1698 = vtanh.f32 %v721_v58 }
 0xa51   :  { %v1699_v63 = vpop.eup %1698 }
 0xa52   :  { %v723_v3 = vmul.f32 %v1699_v63, %v2031_v2 }
 0xa54   :  { %v724_v4 = vadd.f32 %v723_v3, %v2034_v8 }
 0xa56   :  { %727 = vrot.lane.b32.xlu0 %v724_v4, %s1831_s3  ;;  %v725_v7 = vmul.f32 %v724_v4, %v638_v49 }
 0xac8   :  { %v728_v5 = vpop.permute.xlu0 %727 }
 0xac9   :  { %v730_v6 = vmul.f32 %v728_v5, %v724_v4 }
 0xacb   :  { %732 = vrot.lane.b32.xlu1 %v730_v6, %s1832_s10 }
 0xb3d   :  { %v733_v9 = vpop.permute.xlu1 %732 }
 0xb3e   :  { %v735_v10 = vadd.f32 %v733_v9, %v725_v7 }
 0xb40   :  { %1700 = vtanh.f32 %v735_v10 }
 0xb4a   :  { %v1701_v57 = vpop.eup %1700 }
 0xb4b   :  { %738 = vrot.lane.b32.xlu0 %v1701_v57, %s1831_s3 }
 0xbbd   :  { %v739_v11 = vpop.permute.xlu0 %738 }
 0xbbe   :  { %v741_v12 = vmul.f32 %v739_v11, %v724_v4 }
 0xbc0   :  { %743 = vrot.lane.b32.xlu1 %v741_v12, %s1832_s10 }
 0xc32   :  { %v2095_v13 = vpop.permute.xlu1 %743 }
 0xc33   :  { %1551 = vmatmul.mubr.msk.f32.vlgmr.msra.gmra.mrb[8].mxu0 %vm69_vm1, %v2095_v13 }
 0xc34   :  { %1654 = vmatpush3.bf16.msra.mxu0 %v1960_v22  ;;  %1572 = vmatprep.mubr.msk.f32.mxu0 %vm1827_vm0, %v1828_v1 }
 0xc35   :  { %1655 = vmatprep.subr.bf16.mxu0 %v1826_v0 }
 0xc38   :  { %1657 = vmatpush3.bf16.msra.mxu0 %v1970_v25 }
 0xd06   :  { %v813_v14 = vpop.f32.mrb[8].mxu0 }
 0xd07   :  { %v817_v15 = vadd.f32 %v813_v14, %v2023_v60  ;;  %v1552_v16 = vpop.f32.mrb[9].mxu0 }
 0xd09   :  { %v818_v17 = vmul.f32 %v817_v15, %v2031_v2 }
 0xd0b   :  { %1702 = vtanh.f32 %v818_v17 }
 0xd15   :  { %v1703_v18 = vpop.eup %1702 }
 0xd16   :  { %v820_v20 = vmul.f32 %v1703_v18, %v2031_v2 }
 0xd18   :  { %v821_v21 = vadd.f32 %v820_v20, %v2034_v8 }
 0xd1a   :  { %824 = vrot.lane.b32.xlu0 %v821_v21, %s1831_s3  ;;  %v822_v26 = vmul.f32 %v821_v21, %v735_v10 }
 0xd8c   :  { %v825_v23 = vpop.permute.xlu0 %824 }
 0xd8d   :  { %v827_v24 = vmul.f32 %v825_v23, %v821_v21 }
 0xd8f   :  { %829 = vrot.lane.b32.xlu1 %v827_v24, %s1832_s10 }
 0xe01   :  { %v830_v27 = vpop.permute.xlu1 %829 }
 0xe02   :  { %v832_v28 = vadd.f32 %v830_v27, %v822_v26 }
 0xe04   :  { %1704 = vtanh.f32 %v832_v28 }
 0xe0e   :  { %v1705_v60 = vpop.eup %1704 }
 0xe0f   :  { %835 = vrot.lane.b32.xlu0 %v1705_v60, %s1831_s3 }
 0xe81   :  { %v836_v29 = vpop.permute.xlu0 %835 }
 0xe82   :  { %v838_v30 = vmul.f32 %v836_v29, %v821_v21 }
 0xe84   :  { %840 = vrot.lane.b32.xlu1 %v838_v30, %s1832_s10 }
 0xef6   :  { %v841_v31 = vpop.permute.xlu1 %840 }
 0xef7   :  { %1562 = vmatmul.mubr.msk.f32.vlgmr.msra.gmra.mrb[14].mxu1 %vm69_vm1, %v841_v31 }
 0xef8   :  { %1660 = vmatpush3.bf16.msra.mxu1 %v1960_v22  ;;  %1583 = vmatprep.mubr.msk.f32.mxu1 %vm1827_vm0, %v1828_v1 }
 0xef9   :  { %1661 = vmatprep.subr.bf16.mxu1 %v1826_v0 }
 0xefc   :  { %1663 = vmatpush3.bf16.msra.mxu1 %v1970_v25 }
 0xfca   :  { %v910_v32 = vpop.f32.mrb[14].mxu1 }
 0xfcb   :  { %v914_v33 = vadd.f32 %v2021_v59, %v910_v32  ;;  %v1563_v34 = vpop.f32.mrb[15].mxu1  ;;  %v1130_v59 = vld [vmem:[#allocation5] sm:$0xff] }
 0xfcc   :  { %v1664_v42 = vpack.c.bf16 %v1131_v41, %v1130_v59 }
 0xfcd   :  { %v915_v35 = vmul.f32 %v914_v33, %v2031_v2 }
 0xfce   :  { %1665 = vmatprep.subr.bf16.mxu0 %v1664_v42 }
 0xfcf   :  { %1706 = vtanh.f32 %v915_v35 }
 0xfd9   :  { %v1707_v36 = vpop.eup %1706 }
 0xfda   :  { %v917_v38 = vmul.f32 %v1707_v36, %v2031_v2 }
 0xfdc   :  { %v918_v39 = vadd.f32 %v917_v38, %v2034_v8 }
 0xfde   :  { %921 = vrot.lane.b32.xlu0 %v918_v39, %s1831_s3  ;;  %v919_v0 = vmul.f32 %v918_v39, %v832_v28  ;;  %v1384_v28 = vld [vmem:[%s2204_s6] ss:$0 sm:$0xff]  ;;  %s1833_s6 = smov [#allocation7]  }
 0xfdf   :  { %s1344_s15 = sshll.u32 %s1833_s6, 4  ;;  %s1345_s15 = int_to_ptr.vmem [resolvable:$true] %s1344_s15 }
 0xfe0   :  { %s1794_s16 = scalar_lea.vmem %s1345_s15, 1024  ;;  %p1799_p3 = scmp.lt.s32.totalorder %s1345_s15, %s1345_s15 }
 0xfe1   :  { %p1795_p2 = scmp.ne.s32.totalorder %s1345_s15, %s1794_s16  ;;  %p1800_p4 = scmp.lt.s32.totalorder %s1794_s16, %s1794_s16 }
 0xfe3   :  { %p1801_p5 = por %p1800_p4, %p1799_p3 }
 0xfe5   :  { %p1802_p6 = pnand %p1801_p5, %p1795_p2 }
0x1050   :  { %v922_v22 = vpop.permute.xlu0 %921 }
0x1051   :  { %v924_v1 = vmul.f32 %v922_v22, %v918_v39 }
0x1053   :  { %926 = vrot.lane.b32.xlu1 %v924_v1, %s1832_s10 }
0x10c5   :  { %v927_v25 = vpop.permute.xlu1 %926 }
0x10c6   :  { %v929_v40 = vadd.f32 %v927_v25, %v919_v0 }
0x10c8   :  { %1708 = vtanh.f32 %v929_v40 }
0x10d2   :  { %v1709_v43 = vpop.eup %1708 }
0x10d3   :  { %932 = vrot.lane.b32.xlu0 %v1709_v43, %s1831_s3 }
0x1145   :  { %v933_v44 = vpop.permute.xlu0 %932 }
0x1146   :  { %v935_v45 = vmul.f32 %v933_v44, %v918_v39 }
0x1148   :  { %937 = vrot.lane.b32.xlu1 %v935_v45, %s1832_s10 }
0x11ba   :  { %v938_v49 = vpop.permute.xlu1 %937 }
0x11bb   :  { %1573 = vmatmul.mubr.msk.f32.vlgmr.msra.gmra.mrb[10].mxu0 %vm69_vm1, %v938_v49 }
0x11bc   :  { %1667 = vmatpush3.bf16.msra.mxu0 %v1664_v42  ;;  %1594 = vmatprep.mubr.msk.f32.mxu0 %vm69_vm1, %v2042_v19 }
0x11bd   :  { %1669 = vmatprep.subr.bf16.mxu0 %v1668_v48 }
0x11c0   :  { %1671 = vmatpush3.bf16.msra.mxu0 %v1668_v48 }
0x11c3   :  { %1595 = vmatmul.mubr.msk.f32.vlgmr.msra.gmra.mrb[12].mxu0 %vm69_vm1, %v2059_v37 }
0x11c4   :  { %1597 = vmatprep.mubr.msk.f32.mxu0 %vm69_vm1, %v2077_v53 }
0x11c7   :  { %1598 = vmatmul.mubr.msk.f32.gmra.mrb[14].mxu0 %vm69_vm1, %v2095_v13 }
0x11c8   :  { %1600 = vmatprep.mubr.msk.f32.mxu0 %vm69_vm1, %v841_v31 }
0x11cb   :  { %1601 = vmatmul.mubr.msk.f32.gmra.mrb[16].mxu0 %vm69_vm1, %v938_v49 }
0x128e   :  { %v1007_v50 = vpop.f32.mrb[10].mxu0 }
0x128f   :  { %v1011_v51 = vadd.f32 %v1007_v50, %v2029_v62  ;;  %v1574_v52 = vpop.f32.mrb[11].mxu0 }
0x1291   :  { %v1012_v19 = vmul.f32 %v1011_v51, %v2031_v2 }
0x1293   :  { %1710 = vtanh.f32 %v1012_v19 }
0x1296   :  { %v1596_v54 = vpop.f32.mrb[12].mxu0 }
0x1297   :  { %v1212_v55 = vpop.f32.mrb[13].mxu0  ;;  %v1218_v32 = vadd.f32 %v1596_v54, %v1384_v28 }
0x129a   :  { %v1599_v37 = vpop.f32.mrb[14].mxu0 }
0x129b   :  { %v1222_v56 = vpop.f32.mrb[15].mxu0  ;;  %v1228_v60 = vadd.f32 %v1599_v37, %v1384_v28 }
0x129d   :  { %v1711_v58 = vpop.eup %1710 }
0x129e   :  { %v1602_v53 = vpop.f32.mrb[16].mxu0  ;;  %v1014_v63 = vmul.f32 %v1711_v58, %v2031_v2 }
0x129f   :  { %v1232_v3 = vpop.f32.mrb[17].mxu0  ;;  %v1238_v29 = vadd.f32 %v1602_v53, %v1384_v28 }
0x12a0   :  { %v1015_v4 = vadd.f32 %v1014_v63, %v2034_v8  ;;  %v1233_v33 = vadd.f32 %v1384_v28, %v1232_v3 }
0x12a2   :  { %1018 = vrot.lane.b32.xlu0 %v1015_v4, %s1831_s3  ;;  %v1016_v62 = vmul.f32 %v1015_v4, %v929_v40 }
0x1314   :  { %v1019_v5 = vpop.permute.xlu0 %1018 }
0x1315   :  { %v1021_v6 = vmul.f32 %v1019_v5, %v1015_v4 }
0x1317   :  { %1023 = vrot.lane.b32.xlu1 %v1021_v6, %s1832_s10 }
0x1389   :  { %v1024_v7 = vpop.permute.xlu1 %1023 }
0x138a   :  { %v1026_v9 = vadd.f32 %v1024_v7, %v1016_v62 }
0x138c   :  { %1712 = vtanh.f32 %v1026_v9 }
0x1396   :  { %v1713_v10 = vpop.eup %1712 }
0x1397   :  { %1029 = vrot.lane.b32.xlu0 %v1713_v10, %s1831_s3 }
0x1409   :  { %v1030_v57 = vpop.permute.xlu0 %1029 }
0x140a   :  { %v1032_v11 = vmul.f32 %v1030_v57, %v1015_v4 }
0x140c   :  { %1034 = vrot.lane.b32.xlu1 %v1032_v11, %s1832_s10 }
0x147e   :  { %v1035_v12 = vpop.permute.xlu1 %1034 }
0x147f   :  { %1584 = vmatmul.mubr.msk.f32.vlgmr.msra.gmra.mrb[16].mxu1 %vm69_vm1, %v1035_v12  ;;  %1603 = vmatprep.mubr.msk.f32.mxu0 %vm69_vm1, %v1035_v12 }
0x1552   :  { %v1104_v13 = vpop.f32.mrb[16].mxu1 }
0x1553   :  { %v1108_v14 = vadd.f32 %v2027_v61, %v1104_v13  ;;  %v1585_v15 = vpop.f32.mrb[17].mxu1 }
0x1555   :  { %v1109_v16 = vmul.f32 %v1108_v14, %v2031_v2 }
0x1557   :  { %1714 = vtanh.f32 %v1109_v16 }
0x1561   :  { %v1715_v17 = vpop.eup %1714 }
0x1562   :  { %v1111_v18 = vmul.f32 %v1715_v17, %v2031_v2  ;;  %v1213_v2 = vadd.f32 %v1384_v28, %v1212_v55 }
0x1564   :  { %v1112_v20 = vadd.f32 %v1111_v18, %v2034_v8  ;;  %v1223_v8 = vadd.f32 %v1384_v28, %v1222_v56 }
0x1566   :  { %1115 = vrot.lane.b32.xlu0 %v1112_v20, %s1831_s3  ;;  %v1113_v24 = vmul.f32 %v1112_v20, %v1026_v9 }
0x15d8   :  { %v1116_v21 = vpop.permute.xlu0 %1115 }
0x15d9   :  { %v1118_v23 = vmul.f32 %v1116_v21, %v1112_v20 }
0x15db   :  { %1120 = vrot.lane.b32.xlu1 %v1118_v23, %s1832_s10 }
0x164d   :  { %v1121_v26 = vpop.permute.xlu1 %1120 }
0x164e   :  { %v1123_v27 = vadd.f32 %v1121_v26, %v1113_v24 }
0x1650   :  { %1716 = vtanh.f32 %v1123_v27 }
0x165a   :  { %v1717_v61 = vpop.eup %1716 }
0x165b   :  { %1126 = vrot.lane.b32.xlu0 %v1717_v61, %s1831_s3 }
0x167a   :  { %1251 = vmax.xlane.f32.xlu0 %v1213_v2 }
0x167e   :  { %1255 = vmax.xlane.f32.xlu0 %v1223_v8 }
0x1682   :  { %1257 = vmax.xlane.f32.xlu0 %v1228_v60 }
0x1686   :  { %1261 = vmax.xlane.f32.xlu0 %v1238_v29 }
0x16cd   :  { %v1127_v30 = vpop.permute.xlu0 %1126 }
0x16ce   :  { %v1129_v31 = vmul.f32 %v1127_v30, %v1112_v20 }
0x16d0   :  { %1142 = vrot.lane.b32.xlu1 %v1129_v31, %s1832_s10 }
0x16f4   :  { %1253 = vmax.xlane.f32.xlu1 %v1218_v32 }
0x16f8   :  { %1259 = vmax.xlane.f32.xlu1 %v1233_v33 }
0x1707   :  { %v1252_v35 = vpop.xlane.xlu0 %1251 }
0x1708   :  { %v2161_v1 = vsub.f32 %v1213_v2, %v1252_v35 }
0x170a   :  { %v1275_v40 = vmul.f32 1.442695, %v2161_v1 }
0x170b   :  { %v1256_v36 = vpop.xlane.xlu0 %1255 }
0x170c   :  { %v2167_v59 = vsub.f32 %v1223_v8, %v1256_v36 }
0x170e   :  { %v1279_v45 = vmul.f32 1.442695, %v2167_v59 }
0x170f   :  { %v1258_v39 = vpop.xlane.xlu0 %1257 }
0x1710   :  { %v2163_v0 = vsub.f32 %v1228_v60, %v1258_v39 }
0x1712   :  { %v1281_v43 = vmul.f32 1.442695, %v2163_v0 }
0x1713   :  { %v1262_v41 = vpop.xlane.xlu0 %1261 }
0x1714   :  { %v2170_v44 = vsub.f32 %v1238_v29, %v1262_v41 }
0x1716   :  { %v1285_v47 = vmul.f32 1.442695, %v2170_v44 }
0x1742   :  { %v1143_v34 = vpop.permute.xlu1 %1142 }
0x1743   :  { %1604 = vmatmul.mubr.msk.f32.gmra.mrb[18].mxu0 %vm69_vm1, %v1143_v34 }
0x1781   :  { %v1254_v38 = vpop.xlane.xlu1 %1253 }
0x1782   :  { %v2159_v22 = vsub.f32 %v1218_v32, %v1254_v38 }
0x1784   :  { %v1277_v25 = vmul.f32 1.442695, %v2159_v22 }
0x1785   :  { %v1260_v42 = vpop.xlane.xlu1 %1259 }
0x1786   :  { %1718 = vpow2.f32 %v1277_v25  ;;  %v2173_v46 = vsub.f32 %v1233_v33, %v1260_v42 }
0x1787   :  { %1720 = vpow2.f32 %v1275_v40 }
0x1788   :  { %1722 = vpow2.f32 %v1281_v43  ;;  %v1283_v49 = vmul.f32 1.442695, %v2173_v46 }
0x1789   :  { %1724 = vpow2.f32 %v1279_v45 }
0x178a   :  { %1726 = vpow2.f32 %v1285_v47 }
0x178b   :  { %1728 = vpow2.f32 %v1283_v49 }
0x1790   :  { %v1719_v19 = vpop.eup %1718 }
0x1791   :  { %v1721_v54 = vpop.eup %1720 }
0x1792   :  { %v1723_v55 = vpop.eup %1722 }
0x1793   :  { %v1725_v37 = vpop.eup %1724 }
0x1794   :  { %v1727_v56 = vpop.eup %1726 }
0x1795   :  { %v1729_v58 = vpop.eup %1728 }
0x1816   :  { %v1605_v48 = vpop.f32.mrb[18].mxu0 }
0x1817   :  { %v1248_v50 = vadd.f32 %v1605_v48, %v1384_v28  ;;  %v1242_v51 = vpop.f32.mrb[19].mxu0 }
0x1818   :  { %v1243_v52 = vadd.f32 %v1384_v28, %v1242_v51 }
0x1819   :  { %1265 = vmax.xlane.f32.xlu0 %v1248_v50 }
0x181a   :  { %1263 = vmax.xlane.f32.xlu1 %v1243_v52 }
0x181d   :  { %1293 = vadd.xlane.f32.xlu0 %v1719_v19 }
0x181e   :  { %1291 = vadd.xlane.f32.xlu1 %v1721_v54 }
0x1821   :  { %1297 = vadd.xlane.f32.xlu0 %v1723_v55 }
0x1822   :  { %1295 = vadd.xlane.f32.xlu1 %v1725_v37 }
0x1825   :  { %1301 = vadd.xlane.f32.xlu0 %v1727_v56 }
0x1826   :  { %1299 = vadd.xlane.f32.xlu1 %v1729_v58 }
0x18a6   :  { %v1266_v53 = vpop.xlane.xlu0 %1265 }
0x18a7   :  { %v1274_v63 = vsub.f32 %v1248_v50, %v1266_v53  ;;  %v1264_v3 = vpop.xlane.xlu1 %1263 }
0x18a8   :  { %v1273_v4 = vsub.f32 %v1243_v52, %v1264_v3 }
0x18a9   :  { %v1289_v5 = vmul.f32 1.442695, %v1274_v63 }
0x18aa   :  { %v1287_v6 = vmul.f32 1.442695, %v1273_v4  ;;  %v1294_v62 = vpop.xlane.xlu0 %1293 }
0x18ab   :  { %1730 = vpow2.f32 %v1289_v5  ;;  %v1292_v7 = vpop.xlane.xlu1 %1291 }
0x18ac   :  { %1732 = vpow2.f32 %v1287_v6 }
0x18ad   :  { %1734 = vlog2.f32 %v1294_v62 }
0x18ae   :  { %1736 = vlog2.f32 %v1292_v7  ;;  %v1298_v9 = vpop.xlane.xlu0 %1297 }
0x18af   :  { %1738 = vlog2.f32 %v1298_v9  ;;  %v1296_v10 = vpop.xlane.xlu1 %1295 }
0x18b0   :  { %1740 = vlog2.f32 %v1296_v10 }
0x18b2   :  { %v1302_v57 = vpop.xlane.xlu0 %1301 }
0x18b3   :  { %1742 = vlog2.f32 %v1302_v57  ;;  %v1300_v11 = vpop.xlane.xlu1 %1299 }
0x18b4   :  { %1744 = vlog2.f32 %v1300_v11 }
0x18b5   :  { %v1731_v12 = vpop.eup %1730 }
0x18b6   :  { %v1733_v13 = vpop.eup %1732  ;;  %1305 = vadd.xlane.f32.xlu0 %v1731_v12 }
0x18b7   :  { %v1735_v14 = vpop.eup %1734  ;;  %1303 = vadd.xlane.f32.xlu1 %v1733_v13 }
0x18b8   :  { %v1737_v15 = vpop.eup %1736  ;;  %v1310_v16 = vmul.f32 0.6931472, %v1735_v14 }
0x18b9   :  { %v1739_v17 = vpop.eup %1738  ;;  %v1308_v18 = vmul.f32 0.6931472, %v1737_v15 }
0x18ba   :  { %v1741_v20 = vpop.eup %1740  ;;  %v1324_v21 = vsub.f32 %v2159_v22, %v1310_v16  ;;  %v1314_v23 = vmul.f32 0.6931472, %v1739_v17 }
0x18bb   :  { %v1323_v24 = vsub.f32 %v2161_v1, %v1308_v18  ;;  %v1312_v26 = vmul.f32 0.6931472, %v1741_v20 }
0x18bc   :  { %1332 = vst [vmem:[#allocation7 + $0x8] sm:$0xff] %v1324_v21  ;;  %v1326_v27 = vsub.f32 %v2163_v0, %v1314_v23 }
0x18bd   :  { %v1743_v61 = vpop.eup %1742  ;;  %1331 = vst [vmem:[#allocation7] sm:$0xff] %v1323_v24  ;;  %v1325_v28 = vsub.f32 %v2167_v59, %v1312_v26 }
0x18be   :  { %v1745_v2 = vpop.eup %1744  ;;  %1334 = vst [vmem:[#allocation7 + $0x18] sm:$0xff] %v1326_v27  ;;  %v1318_v8 = vmul.f32 0.6931472, %v1743_v61 }
0x18bf   :  { %1333 = vst [vmem:[#allocation7 + $0x10] sm:$0xff] %v1325_v28  ;;  %v1316_v60 = vmul.f32 0.6931472, %v1745_v2 }
0x18c0   :  { %v1328_v29 = vsub.f32 %v2170_v44, %v1318_v8 }
0x18c1   :  { %v1327_v30 = vsub.f32 %v2173_v46, %v1316_v60 }
0x18c2   :  { %1336 = vst [vmem:[#allocation7 + $0x28] sm:$0xff] %v1328_v29 }
0x18c3   :  { %1335 = vst [vmem:[#allocation7 + $0x20] sm:$0xff] %v1327_v30 }
0x1943   :  { %v1306_v31 = vpop.xlane.xlu0 %1305 }
0x1944   :  { %1746 = vlog2.f32 %v1306_v31  ;;  %v1304_v32 = vpop.xlane.xlu1 %1303 }
0x1945   :  { %1748 = vlog2.f32 %v1304_v32 }
0x194e   :  { %v1747_v33 = vpop.eup %1746 }
0x194f   :  { %v1749_v34 = vpop.eup %1748  ;;  %v1322_v35 = vmul.f32 0.6931472, %v1747_v33 }
0x1950   :  { %v1320_v36 = vmul.f32 0.6931472, %v1749_v34 }
0x1951   :  { %v1330_v38 = vsub.f32 %v1274_v63, %v1322_v35 }
0x1952   :  { %v1329_v39 = vsub.f32 %v1273_v4, %v1320_v36 }
0x1953   :  { %1338 = vst [vmem:[#allocation7 + $0x38] sm:$0xff] %v1330_v38 }
0x1954   :  { %1337 = vst [vmem:[#allocation7 + $0x30] sm:$0xff] %v1329_v39 }
0x1955   :  { %1805 = shalt.err (!%p1802_p6)
}
0x1956   :  { %s1806_s2 = scalar_lea.hbm %s2205_s7, 1024 }
0x1957   :  { %p1807_p7 = scmp.ne.s32.totalorder %s2205_s7, %s1806_s2  ;;  %p1810_p8 = scmp.lt.u32.totalorder %s1806_s2, %s2205_s7 }
0x1959   :  { %p1812_p9 = pnand %p1810_p8, %p1807_p7 }
0x195b   :  { %1815 = shalt.err (!%p1812_p9)
}
0x195c   :  { %1350 = dma.vmem_to_hbm [thread:$0]  %s1345_s15, 1024, %s2205_s7, [#allocation4], %s1823_s11, %s1823_s11, %s1824_s12  }
0x195d   :  { %1820 = dma.done.wait [#allocation4], 1024  }
0x195e   :  { %1821 = vsyncadd [#allocation4], 4294966272 }
0x195f   :  { %1354 = vsyncpa [#allocation3], 1 }
0x1960   :  { %1355 = vsyncpa [#allocation6], 1 }
0x1961   :  { %1356 = vsyncpa [#allocation4], 1 }

</bundles_post_ra>
